<compile_context>
chip_gen: v7x
topology: tpu7x:2x2x1
jax: 0.10.0
libtpu: 0.0.40
codegen_flags: <defaults>
</compile_context>

<pallas_src>
import jax
import jax.numpy as jnp
from jax.experimental import pallas as pl
from jax.experimental.pallas import tpu as pltpu

BN_EPS = 1e-5


def _make_kernel(nb):
    def kernel(inp_ref, w_ref, shift_ref, skip_ref, o_ref):
        # inp_ref  : (nb, C_in, TL)
        # w_ref    : (C_out, C_in)   -- BN scale folded in, dtype == inp dtype
        # shift_ref: (C_out, 1)      -- f32 folded BN shift
        # skip_ref : (nb, C_out, TL)
        # o_ref    : (nb, C_out, TL)
        w = w_ref[...]            # hoisted: resident across the grid
        shift = shift_ref[...]
        for b in range(nb):       # nb is a small static compile-time constant
            y = jnp.dot(w, inp_ref[b], preferred_element_type=jnp.float32)  # MXU
            y = y + shift                                   # folded BN shift (f32)
            y = y + skip_ref[b].astype(jnp.float32)         # residual add (f32)
            o_ref[b] = jnp.maximum(y, 0.0).astype(o_ref.dtype)  # ReLU, cast at store
    return kernel


def _choose_tiling(n, length, tl_max):
    """Pick (nb, tl).

    tl: multiple of 128 (lane-dense stores), as large as tl_max / padded L allow,
        but shrunk so the grid keeps >= ~4 steps (both v7x TensorCores busy).
    nb: batch rows per step; raised when L tiles are narrow (< 1024 lanes) to
        amortize the ~0.35 us per-step overhead, while keeping >= ~4 grid steps.
    """
    tl_max = max(128, (int(tl_max) // 128) * 128)      # enforce lane-aligned tile
    l_pad = ((length + 127) // 128) * 128
    tl = min(tl_max, l_pad)
    while tl > 128 and n * ((length + tl - 1) // tl) < 4:
        tl = max(128, ((tl // 2) // 128) * 128)
    l_tiles = (length + tl - 1) // tl

    nb = 1
    if tl < 1024 and n > 1:
        nb = min(n, max(1, 1024 // tl))
        # keep nb a divisor of n and the grid at >= ~4 steps when possible
        while nb > 1 and (n % nb != 0 or ((n + nb - 1) // nb) * l_tiles < 4):
            nb -= 1
    return nb, tl


def shortcut1d(inp, skip, weight, gamma, beta, running_mean, running_var, *, tl_max=2048):
    """inp: (N, C_in, L); skip: (N, C_out, L); weight: (C_out, C_in) or (C_out, C_in, 1)."""
    if weight.ndim == 3:                 # raw PyTorch Conv1d weight (C_out, C_in, 1)
        weight = weight[..., 0]
    n, c_in, length = inp.shape
    c_out = weight.shape[0]
    assert weight.shape == (c_out, c_in)
    assert skip.shape == (n, c_out, length)

    # Fold eval-mode BatchNorm into the conv weight (tiny XLA ops outside the kernel).
    scale = gamma.astype(jnp.float32) / jnp.sqrt(running_var.astype(jnp.float32) + BN_EPS)
    # Keep the folded weight in the input dtype: bf16 inputs -> native bf16 MXU matmul
    # (f32 accumulate) and half the HBM traffic on the streamed operands.
    w_folded = (scale[:, None] * weight.astype(jnp.float32)).astype(inp.dtype)    # (C_out, C_in)
    shift = (beta.astype(jnp.float32)
             - scale * running_mean.astype(jnp.float32)).reshape(c_out, 1)        # f32

    nb, tl = _choose_tiling(n, length, tl_max)
    grid = (pl.cdiv(n, nb), pl.cdiv(length, tl))

    out_dtype = skip.dtype
    flops = 2 * c_out * c_in * n * length
    bytes_accessed = int(
        n * c_in * length * inp.dtype.itemsize                 # inp read
        + n * c_out * length * skip.dtype.itemsize             # skip read
        + n * c_out * length * jnp.dtype(out_dtype).itemsize   # out write
        + c_out * c_in * w_folded.dtype.itemsize + c_out * 4)  # weight + shift

    # Only request a larger scoped-VMEM limit when the double-buffered streaming
    # working set would exceed v5e's 16 MiB default (never at default tl<=2048).
    block_bytes = nb * tl * (c_in * inp.dtype.itemsize
                             + c_out * skip.dtype.itemsize
                             + c_out * jnp.dtype(out_dtype).itemsize)
    resident_bytes = c_out * c_in * w_folded.dtype.itemsize + c_out * 4
    vmem_needed = 2 * block_bytes + 2 * resident_bytes + (1 << 20)
    cp_kwargs = dict(dimension_semantics=("parallel", "parallel"))
    if vmem_needed > (16 << 20):
        cp_kwargs["vmem_limit_bytes"] = int(min(vmem_needed, 64 << 20))

    return pl.pallas_call(
        _make_kernel(nb),
        out_shape=jax.ShapeDtypeStruct((n, c_out, length), out_dtype),
        grid_spec=pltpu.PrefetchScalarGridSpec(
            num_scalar_prefetch=0,
            grid=grid,
            in_specs=[
                pl.BlockSpec((nb, c_in, tl), lambda b, l: (b, 0, l)),
                pl.BlockSpec((c_out, c_in), lambda b, l: (0, 0)),   # resident across grid
                pl.BlockSpec((c_out, 1), lambda b, l: (0, 0)),      # resident across grid
                pl.BlockSpec((nb, c_out, tl), lambda b, l: (b, 0, l)),
            ],
            out_specs=pl.BlockSpec((nb, c_out, tl), lambda b, l: (b, 0, l)),
        ),
        compiler_params=pltpu.CompilerParams(**cp_kwargs),
        cost_estimate=pl.CostEstimate(
            flops=flops, transcendentals=0, bytes_accessed=bytes_accessed),
    )(inp, w_folded, shift, skip)


def _reference(inp, skip, weight, gamma, beta, running_mean, running_var):
    inp = inp.astype(jnp.float32)
    skip = skip.astype(jnp.float32)
    y = jnp.einsum("oc,ncl->nol", weight, inp)
    y = (y - running_mean[None, :, None]) / jnp.sqrt(running_var[None, :, None] + BN_EPS)
    y = y * gamma[None, :, None] + beta[None, :, None]
    return jnp.maximum(skip + y, 0.0)


if __name__ == "__main__":
    key = jax.random.PRNGKey(0)
    k_inp, k_skip, k_w, k_g, k_b, k_m, k_v = jax.random.split(key, 7)

    N, C_IN, C_OUT, L = 2, 4, 128, 16
    inp = jax.random.normal(k_inp, (N, C_IN, L), dtype=jnp.float32)
    skip = jax.random.normal(k_skip, (N, C_OUT, L), dtype=jnp.float32)

    # nn.Conv1d(C_IN, 128, kernel_size=1, bias=False) weight (128, C_IN, 1) squeezed to (128, C_IN)
    weight = jax.random.normal(k_w, (C_OUT, C_IN), dtype=jnp.float32) * 0.1
    # BatchNorm1d(128) parameters / running statistics (deterministic synthetic values)
    gamma = 1.0 + 0.1 * jax.random.normal(k_g, (C_OUT,), dtype=jnp.float32)
    beta = 0.1 * jax.random.normal(k_b, (C_OUT,), dtype=jnp.float32)
    running_mean = 0.1 * jax.random.normal(k_m, (C_OUT,), dtype=jnp.float32)
    running_var = 1.0 + 0.05 * jax.random.uniform(k_v, (C_OUT,), dtype=jnp.float32)

    # 1) Base f32 check (module-sized small shapes).
    out = shortcut1d(inp, skip, weight, gamma, beta, running_mean, running_var)
    out = jax.block_until_ready(out)
    ref = _reference(inp, skip, weight, gamma, beta, running_mean, running_var)
    assert out.shape == (N, C_OUT, L)
    assert jnp.allclose(out, ref, atol=1e-5, rtol=1e-5), "mismatch vs reference (small L)"

    # 2) Multi-tile L axis with a ragged trailing tile (tl_max=128 -> 3 L tiles).
    L2 = 272
    inp2 = jax.random.normal(k_inp, (N, C_IN, L2), dtype=jnp.float32)
    skip2 = jax.random.normal(k_skip, (N, C_OUT, L2), dtype=jnp.float32)
    out2 = shortcut1d(inp2, skip2, weight, gamma, beta, running_mean, running_var, tl_max=128)
    out2 = jax.block_until_ready(out2)
    ref2 = _reference(inp2, skip2, weight, gamma, beta, running_mean, running_var)
    assert jnp.allclose(out2, ref2, atol=1e-5, rtol=1e-5), "mismatch vs reference (tiled L)"

    # 3) Batch-blocking path (nb > 1): short L, larger N -> several batch rows per step.
    N3, L3 = 16, 16
    inp3 = jax.random.normal(k_inp, (N3, C_IN, L3), dtype=jnp.float32)
    skip3 = jax.random.normal(k_skip, (N3, C_OUT, L3), dtype=jnp.float32)
    out3 = shortcut1d(inp3, skip3, weight, gamma, beta, running_mean, running_var)
    out3 = jax.block_until_ready(out3)
    ref3 = _reference(inp3, skip3, weight, gamma, beta, running_mean, running_var)
    assert jnp.allclose(out3, ref3, atol=1e-5, rtol=1e-5), "mismatch vs reference (batch-blocked)"

    # 4) bf16 I/O path: bf16 inp/skip, bf16 output, f32 accumulate inside the kernel.
    L4 = 256
    inp4 = jax.random.normal(k_inp, (N, C_IN, L4), dtype=jnp.float32).astype(jnp.bfloat16)
    skip4 = jax.random.normal(k_skip, (N, C_OUT, L4), dtype=jnp.float32).astype(jnp.bfloat16)
    out4 = shortcut1d(inp4, skip4, weight, gamma, beta, running_mean, running_var)
    out4 = jax.block_until_ready(out4)
    assert out4.dtype == jnp.bfloat16
    ref4 = _reference(inp4, skip4, weight, gamma, beta, running_mean, running_var)
    assert jnp.allclose(out4.astype(jnp.float32), ref4, atol=1e-1, rtol=1e-1), \
        "mismatch vs reference (bf16 path)"

    print("KERNEL_OK")
</pallas_src>

<mosaic_0001>
module attributes {stable_mosaic.version = 11 : i64} {
  func.func @kernel(%arg0: i32, %arg1: i32, %arg2: memref<1x4x128xf32, #tpu.memory_space<vmem>>, %arg3: memref<128x4xf32, #tpu.memory_space<vmem>>, %arg4: memref<128x1xf32, #tpu.memory_space<vmem>>, %arg5: memref<1x128x128xf32, #tpu.memory_space<vmem>>, %arg6: memref<1x128x128xf32, #tpu.memory_space<vmem>>) attributes {dimension_semantics = [#tpu.dimension_semantics<parallel>, #tpu.dimension_semantics<parallel>], iteration_bounds = array<i64: 2, 1>, scalar_prefetch = 0 : i64, scratch_operands = 0 : i64, tpu.core_type = #tpu.core_type<tc>, window_params = [{transform_indices = @transform_0, window_bounds = array<i64: 1, 4, 128>}, {pipeline_mode = #tpu.pipeline_mode<synchronous>, transform_indices = @transform_1, window_bounds = array<i64: 128, 4>}, {pipeline_mode = #tpu.pipeline_mode<synchronous>, transform_indices = @transform_2, window_bounds = array<i64: 128, 1>}, {transform_indices = @transform_3, window_bounds = array<i64: 1, 128, 128>}, {transform_indices = @transform_4, window_bounds = array<i64: 1, 128, 128>}]} {
    %c0 = arith.constant 0 : index
    %c0_0 = arith.constant 0 : index
    %0 = vector.load %arg3[%c0, %c0_0] : memref<128x4xf32, #tpu.memory_space<vmem>>, vector<128x4xf32>
    %c0_1 = arith.constant 0 : index
    %c0_2 = arith.constant 0 : index
    %1 = vector.load %arg4[%c0_1, %c0_2] : memref<128x1xf32, #tpu.memory_space<vmem>>, vector<128x1xf32>
    %c0_3 = arith.constant 0 : index
    %c0_4 = arith.constant 0 : index
    %c0_5 = arith.constant 0 : index
    %2 = vector.load %arg2[%c0_3, %c0_4, %c0_5] : memref<1x4x128xf32, #tpu.memory_space<vmem>>, vector<1x4x128xf32>
    %3 = vector.shape_cast %2 : vector<1x4x128xf32> to vector<4x128xf32>
    %cst = arith.constant dense<0.000000e+00> : vector<128x128xf32>
    %4 = tpu.matmul %0, %3, %cst {dimension_numbers = #tpu.dot_dimension_numbers<[1], [0], [0], [1], [0, 0, 1, 1], [], []>} : vector<128x4xf32>, vector<4x128xf32>, vector<128x128xf32> -> vector<128x128xf32>
    %5 = vector.broadcast %1 : vector<128x1xf32> to vector<128x128xf32>
    %6 = arith.addf %4, %5 : vector<128x128xf32>
    %c0_6 = arith.constant 0 : index
    %c0_7 = arith.constant 0 : index
    %c0_8 = arith.constant 0 : index
    %7 = vector.load %arg5[%c0_6, %c0_7, %c0_8] : memref<1x128x128xf32, #tpu.memory_space<vmem>>, vector<1x128x128xf32>
    %8 = vector.shape_cast %7 : vector<1x128x128xf32> to vector<128x128xf32>
    %9 = arith.addf %6, %8 : vector<128x128xf32>
    %cst_9 = arith.constant 0.000000e+00 : f32
    %10 = vector.broadcast %cst_9 : f32 to vector<128x128xf32>
    %11 = arith.maximumf %9, %10 : vector<128x128xf32>
    %c0_10 = arith.constant 0 : index
    %c0_11 = arith.constant 0 : index
    %c0_12 = arith.constant 0 : index
    %12 = vector.load %arg6[%c0_10, %c0_11, %c0_12] : memref<1x128x128xf32, #tpu.memory_space<vmem>>, vector<1x128x128xf32>
    %13 = vector.shape_cast %12 : vector<1x128x128xf32> to vector<128x128xf32>
    %14 = vector.shape_cast %11 : vector<128x128xf32> to vector<1x128x128xf32>
    tpu.vector_store %arg6[%c0_10, %c0_11, %c0_12], %14 {strides = array<i32>} : memref<1x128x128xf32, #tpu.memory_space<vmem>>, vector<1x128x128xf32>,
    return
  }
  func.func @transform_0(%arg0: i32, %arg1: i32) -> (i32, i32, i32) {
    %c0_i32 = arith.constant 0 : i32
    %c0_i32_0 = arith.constant 0 : i32
    return %arg0, %c0_i32, %arg1 : i32, i32, i32
  }
  func.func @transform_1(%arg0: i32, %arg1: i32) -> (i32, i32) {
    %c0_i32 = arith.constant 0 : i32
    %c0_i32_0 = arith.constant 0 : i32
    %c0_i32_1 = arith.constant 0 : i32
    return %c0_i32, %c0_i32_0 : i32, i32
  }
  func.func @transform_2(%arg0: i32, %arg1: i32) -> (i32, i32) {
    %c0_i32 = arith.constant 0 : i32
    %c0_i32_0 = arith.constant 0 : i32
    %c0_i32_1 = arith.constant 0 : i32
    return %c0_i32, %c0_i32_0 : i32, i32
  }
  func.func @transform_3(%arg0: i32, %arg1: i32) -> (i32, i32, i32) {
    %c0_i32 = arith.constant 0 : i32
    %c0_i32_0 = arith.constant 0 : i32
    return %arg0, %c0_i32, %arg1 : i32, i32, i32
  }
  func.func @transform_4(%arg0: i32, %arg1: i32) -> (i32, i32, i32) {
    %c0_i32 = arith.constant 0 : i32
    %c0_i32_0 = arith.constant 0 : i32
    return %arg0, %c0_i32, %arg1 : i32, i32, i32
  }
}

</mosaic_0001>

<bundles_post_ra>
// kernel: tpu_custom_call.1
= control target key start
LH: loop header
LB: loop body
LE: loop exit
PB: predicated region body
PF: predicated region fallthrough
CT: control target
= control target key end

     0   :  { %s883_s15 = smov 0   ;;  %s885_s16 = smov 0   ;;  %s1080_s0 = inlined_call_operand.vmem [shape: f32[2,4,16], index: 0, kind: input, shape index: {}]   ;;  %s1081_s1 = inlined_call_operand.vmem [shape: f32[128,4], index: 1, kind: input, shape index: {}]   ;;  %s1082_s2 = inlined_call_operand.vmem [shape: f32[128,1], index: 2, kind: input, shape index: {}]   ;;  %s1083_s3 = inlined_call_operand.vmem [shape: f32[2,128,16], index: 3, kind: input, shape index: {}]   ;;  %s1084_s4 = inlined_call_operand.vmem [shape: f32[2,128,16], index: 4, kind: output, shape index: {}]  }
   0x1   :  { %s887_s17 = smov 0  }
   0x2 LB: > { %s26_s18 = sadd.s32 1, %s851_s16  ;;  %p734_p0 = scmp.ge.s32.totalorder %s855_s17, 1  ;;  %s855_s17 = sphi %s887_s17, %s14_s17   ;;  %s851_s16 = sphi %s885_s16, %s1086_s16   ;;  %s847_s15 = sphi %s883_s15, %s1085_s15  }
   0x3   : > { %p28_p1 = scmp.ge.s32.totalorder %s26_s18, 2  ;;  %p195_p2 = scmp.lt.s32.totalorder %s855_s17, 3 }
   0x5   : > { %s1088_s18 = smov (%p28_p1, %s26_s18), 0  ;;  %p196_p3 = pnand %p734_p0, %p195_p2 }
   0x6   : > { %p234_p4 = scmp.lt.s32.totalorder (!%p196_p3), %s847_s15, 1  ;;  %v257_v0 = vld [vmem:[%s1081_s1] sm:$0xff] (!%p196_p3)  ;;  %vm370_vm0 = vcmask (!%p196_p3), 31744   ;;  %v857_v2 = vmov (!%p196_p3), 0   ;;  %vm419_vm1 = vcmask (!%p196_p3), 1043456   ;;  %v275_v3 = vld [vmem:[%s1082_s2 + $0x10] sm:$0xff] (!%p196_p3) }
   0x7   : > { %199 = sbr.rel (%p196_p3) target bundleno = 252 (0xfc), region = 36  ;;  %v265_v1 = vld [vmem:[%s1081_s1 + $0x40] sm:$0xff] (!%p196_p3)  ;;  %780 = vmatprep.mubr.msk.f32.mxu0 (!%p196_p3), %vm370_vm0, %v257_v0  ;;  %832 = vset.pattern.permute.xlu1 (!%p196_p3), %v857_v2  ;;  %v258_v6 = vld [vmem:[%s1081_s1 + $0x8] sm:$0xff] (!%p196_p3)  ;;  %v259_v8 = vld [vmem:[%s1081_s1 + $0x10] sm:$0xff] (!%p196_p3) }
   0x8   : > { %792 = vmatprep.mubr.msk.f32.mxu1 (!%p196_p3), %vm370_vm0, %v265_v1  ;;  %831 = vset.pattern.permute.xlu0 (!%p196_p3), %v857_v2  ;;  %v273_v4 = vld [vmem:[%s1082_s2] sm:$0xff] (!%p196_p3)  ;;  %v266_v7 = vld [vmem:[%s1081_s1 + $0x48] sm:$0xff] (!%p196_p3)  ;;  %v267_v9 = vld [vmem:[%s1081_s1 + $0x50] sm:$0xff] (!%p196_p3) }
   0x9   : > { %302 = vperm.xlu1 (!%p196_p3), %832, %v275_v3   ;;  %292 = vperm.xlu0 (!%p196_p3), %831, %v273_v4   ;;  %v276_v10 = vld [vmem:[%s1082_s2 + $0x18] sm:$0xff] (!%p196_p3)  ;;  %v274_v11 = vld [vmem:[%s1082_s2 + $0x8] sm:$0xff] (!%p196_p3)  ;;  %v261_v14 = vld [vmem:[%s1081_s1 + $0x20] sm:$0xff] (!%p196_p3) }
   0xa   : > { %v260_v12 = vld [vmem:[%s1081_s1 + $0x18] sm:$0xff] (!%p196_p3)  ;;  %v269_v15 = vld [vmem:[%s1081_s1 + $0x60] sm:$0xff] (!%p196_p3)  ;;  %v278_v16 = vld [vmem:[%s1082_s2 + $0x28] sm:$0xff] (!%p196_p3) }
   0xb   : > { %v268_v13 = vld [vmem:[%s1081_s1 + $0x58] sm:$0xff] (!%p196_p3)  ;;  %v277_v17 = vld [vmem:[%s1082_s2 + $0x20] sm:$0xff] (!%p196_p3)  ;;  %v262_v18 = vld [vmem:[%s1081_s1 + $0x28] sm:$0xff] (!%p196_p3) }
   0xc   : > { %v270_v19 = vld [vmem:[%s1081_s1 + $0x68] sm:$0xff] (!%p196_p3)  ;;  %v263_v20 = vld [vmem:[%s1081_s1 + $0x30] sm:$0xff] (!%p196_p3)  ;;  %v280_v22 = vld [vmem:[%s1082_s2 + $0x38] sm:$0xff] (!%p196_p3) }
   0xd   : > { %307 = vperm.xlu1 (!%p196_p3), %832, %v276_v10   ;;  %297 = vperm.xlu0 (!%p196_p3), %831, %v274_v11   ;;  %v271_v21 = vld [vmem:[%s1081_s1 + $0x70] sm:$0xff] (!%p196_p3)  ;;  %v264_v24 = vld [vmem:[%s1081_s1 + $0x38] sm:$0xff] (!%p196_p3)  ;;  %v282_v26 = vld [vmem:[%s1082_s2 + $0x48] sm:$0xff] (!%p196_p3) }
   0xe   : > { %s1090_s15 = smov (!%p234_p4, %s847_s15), 1  ;;  %v279_v23 = vld [vmem:[%s1082_s2 + $0x30] sm:$0xff]  ;;  %v272_v25 = vld [vmem:[%s1081_s1 + $0x78] sm:$0xff]  ;;  %v281_v27 = vld [vmem:[%s1082_s2 + $0x40] sm:$0xff] }
   0xf   : > { %s735_s23 = sshll.u32 %s1090_s15, 2  ;;  %v284_v28 = vld [vmem:[%s1082_s2 + $0x58] sm:$0xff]  ;;  %v283_v29 = vld [vmem:[%s1082_s2 + $0x50] sm:$0xff]  ;;  %v286_v30 = vld [vmem:[%s1082_s2 + $0x68] sm:$0xff]  ;;  %s759_s21 = sshll.u32 %s1090_s15, 7 }
  0x10   : > { %s240_s26 = scalar_lea.vmem %s1080_s0, %s735_s23  ;;  %v285_v31 = vld [vmem:[%s1082_s2 + $0x60] sm:$0xff]  ;;  %v288_v32 = vld [vmem:[%s1082_s2 + $0x78] sm:$0xff]  ;;  %v287_v33 = vld [vmem:[%s1082_s2 + $0x70] sm:$0xff]  ;;  %s1029_s24 = scalar_lea.vmem %s1083_s3, %s759_s21 }
  0x11   : > { %v289_v5 = vld [vmem:[%s240_s26] sm:$0xf]  ;;  %317 = vperm.xlu1 %832, %v278_v16   ;;  %312 = vperm.xlu0 %831, %v277_v17   ;;  %v569_v47 = vld [vmem:[%s1029_s24 + $0x8] sm:$0xff]  ;;  %s1038_s26 = scalar_lea.vmem %s1084_s4, %s759_s21  ;;  %v571_v1 = vld [vmem:[%s1029_s24 + $0x18] sm:$0xff] }
  0x12   : > { %778 = vmatprep.subr.msk.mxu0 %vm419_vm1, %v289_v5  ;;  %804 = vmatprep.subr.msk.mxu1 %vm419_vm1, %v289_v5  ;;  %v577_v49 = vld [vmem:[%s1029_s24 + $0x48] sm:$0xff]  ;;  %v568_v53 = vld [vmem:[%s1029_s24] sm:$0xff]  ;;  %v579_v3 = vld [vmem:[%s1029_s24 + $0x58] sm:$0xff] }
  0x13   : > { %779 = vmatpush3.msk.msra.mxu0 %vm419_vm1, %v289_v5  ;;  %805 = vmatpush3.msk.msra.mxu1 %vm419_vm1, %v289_v5  ;;  %v576_v55 = vld [vmem:[%s1029_s24 + $0x40] sm:$0xff]  ;;  %v578_v11 = vld [vmem:[%s1029_s24 + $0x50] sm:$0xff] }
  0x14   : > { %781 = vmatmul.mubr.msk.f32.vlgmr.msra.gmra.mrb[0].mxu0 %vm370_vm0, %v258_v6  ;;  %793 = vmatmul.mubr.msk.f32.vlgmr.msra.gmra.mrb[0].mxu1 %vm370_vm0, %v266_v7 }
  0x15   : > { %783 = vmatprep.mubr.msk.f32.mxu0 %vm370_vm0, %v259_v8  ;;  %795 = vmatprep.mubr.msk.f32.mxu1 %vm370_vm0, %v267_v9  ;;  %v570_v9 = vld [vmem:[%s1029_s24 + $0x10] sm:$0xff] }
  0x16   : > { %327 = vperm.xlu1 %832, %v280_v22   ;;  %322 = vperm.xlu0 %831, %v279_v23   ;;  %v581_v23 = vld [vmem:[%s1029_s24 + $0x68] sm:$0xff] }
  0x18   : > { %784 = vmatmul.mubr.msk.f32.gmra.mrb[2].mxu0 %vm370_vm0, %v260_v12  ;;  %796 = vmatmul.mubr.msk.f32.gmra.mrb[2].mxu1 %vm370_vm0, %v268_v13 }
  0x19   : > { %786 = vmatprep.mubr.msk.f32.mxu0 %vm370_vm0, %v261_v14  ;;  %798 = vmatprep.mubr.msk.f32.mxu1 %vm370_vm0, %v269_v15 }
  0x1a   : > { %337 = vperm.xlu1 %832, %v282_v26   ;;  %332 = vperm.xlu0 %831, %v281_v27  }
  0x1c   : > { %787 = vmatmul.mubr.msk.f32.gmra.mrb[4].mxu0 %vm370_vm0, %v262_v18  ;;  %799 = vmatmul.mubr.msk.f32.gmra.mrb[4].mxu1 %vm370_vm0, %v270_v19 }
  0x1d   : > { %789 = vmatprep.mubr.msk.f32.mxu0 %vm370_vm0, %v263_v20  ;;  %801 = vmatprep.mubr.msk.f32.mxu1 %vm370_vm0, %v271_v21  ;;  %v573_v21 = vld [vmem:[%s1029_s24 + $0x28] sm:$0xff] }
  0x1e   : > { %347 = vperm.xlu1 %832, %v284_v28   ;;  %342 = vperm.xlu0 %831, %v283_v29   ;;  %v572_v29 = vld [vmem:[%s1029_s24 + $0x20] sm:$0xff] }
  0x20   : > { %790 = vmatmul.mubr.msk.f32.gmra.mrb[6].mxu0 %vm370_vm0, %v264_v24  ;;  %802 = vmatmul.mubr.msk.f32.gmra.mrb[6].mxu1 %vm370_vm0, %v272_v25 }
  0x22   : > { %357 = vperm.xlu1 %832, %v286_v30   ;;  %352 = vperm.xlu0 %831, %v285_v31   ;;  %v580_v31 = vld [vmem:[%s1029_s24 + $0x60] sm:$0xff] }
  0x26   : > { %367 = vperm.xlu1 %832, %v288_v32   ;;  %362 = vperm.xlu0 %831, %v287_v33  }
  0x88   : > { %v303_v34 = vpop.permute.xlu1 %302  ;;  %v293_v35 = vpop.permute.xlu0 %292 }
  0x8c   : > { %v308_v36 = vpop.permute.xlu1 %307  ;;  %v298_v37 = vpop.permute.xlu0 %297 }
  0x90   : > { %v318_v38 = vpop.permute.xlu1 %317  ;;  %v1019_v39 = vpop.permute.xlu0 %312 }
  0x95   : > { %v1021_v40 = vpop.permute.xlu1 %327  ;;  %v1023_v41 = vpop.permute.xlu0 %322 }
  0x99   : > { %v338_v42 = vpop.permute.xlu1 %337  ;;  %v333_v43 = vpop.permute.xlu0 %332 }
  0x9d   : > { %v348_v44 = vpop.permute.xlu1 %347  ;;  %v343_v45 = vpop.permute.xlu0 %342 }
  0xa1   : > { %v358_v58 = vpop.permute.xlu1 %357  ;;  %v353_v59 = vpop.permute.xlu0 %352 }
  0xe7   : > { %v782_v46 = vpop.f32.mrb[0].mxu0  ;;  %v794_v48 = vpop.f32.mrb[0].mxu1 }
  0xe8   : > { %v495_v50 = vadd.f32 %v782_v46, %v298_v37  ;;  %v535_v51 = vadd.f32 %v794_v48, %v338_v42  ;;  %v489_v52 = vpop.f32.mrb[1].mxu0  ;;  %v529_v54 = vpop.f32.mrb[1].mxu1  ;;  %v575_v46 = vld [vmem:[%s1029_s24 + $0x38] sm:$0xff] }
  0xe9   : > { %v490_v56 = vadd.f32 %v489_v52, %v293_v35  ;;  %v530_v57 = vadd.f32 %v529_v54, %v333_v43  ;;  %v363_v37 = vpop.permute.xlu0 %362  ;;  %v583_v48 = vld [vmem:[%s1029_s24 + $0x78] sm:$0xff] }
  0xea   : > { %v585_v60 = vadd.f32 %v569_v47, %v495_v50  ;;  %v593_v61 = vadd.f32 %v577_v49, %v535_v51 }
  0xeb   : > { %v584_v62 = vadd.f32 %v568_v53, %v490_v56  ;;  %v592_v63 = vadd.f32 %v576_v55, %v530_v57  ;;  %v785_v0 = vpop.f32.mrb[2].mxu0  ;;  %v797_v2 = vpop.f32.mrb[2].mxu1  ;;  %v574_v53 = vld [vmem:[%s1029_s24 + $0x30] sm:$0xff] }
  0xec   : > { %v601_v4 = vmax.f32 %v585_v60, 0.0  ;;  %v609_v5 = vmax.f32 %v593_v61, 0.0  ;;  %v505_v6 = vadd.f32 %v785_v0, %v308_v36  ;;  %v545_v7 = vadd.f32 %v797_v2, %v348_v44  ;;  %v499_v8 = vpop.f32.mrb[3].mxu0  ;;  %v539_v10 = vpop.f32.mrb[3].mxu1  ;;  %v582_v55 = vld [vmem:[%s1029_s24 + $0x70] sm:$0xff] }
  0xed   : > { %v600_v12 = vmax.f32 %v584_v62, 0.0  ;;  %v608_v13 = vmax.f32 %v592_v63, 0.0  ;;  %v500_v14 = vadd.f32 %v499_v8, %v303_v34  ;;  %v540_v15 = vadd.f32 %v539_v10, %v343_v45  ;;  %v368_v36 = vpop.permute.xlu1 %367 }
  0xee   : > { %617 = vst [vmem:[%s1038_s26 + $0x8] sm:$0xff] %v601_v4  ;;  %625 = vst [vmem:[%s1038_s26 + $0x48] sm:$0xff] %v609_v5  ;;  %v587_v16 = vadd.f32 %v571_v1, %v505_v6  ;;  %v595_v17 = vadd.f32 %v579_v3, %v545_v7 }
  0xef   : > { %616 = vst [vmem:[%s1038_s26] sm:$0xff] %v600_v12  ;;  %624 = vst [vmem:[%s1038_s26 + $0x40] sm:$0xff] %v608_v13  ;;  %v586_v18 = vadd.f32 %v570_v9, %v500_v14  ;;  %v594_v19 = vadd.f32 %v578_v11, %v540_v15  ;;  %v788_v20 = vpop.f32.mrb[4].mxu0  ;;  %v800_v22 = vpop.f32.mrb[4].mxu1 }
  0xf0   : > { %v603_v24 = vmax.f32 %v587_v16, 0.0  ;;  %v611_v25 = vmax.f32 %v595_v17, 0.0  ;;  %v515_v26 = vadd.f32 %v788_v20, %v318_v38  ;;  %v555_v27 = vadd.f32 %v800_v22, %v358_v58  ;;  %v509_v28 = vpop.f32.mrb[5].mxu0  ;;  %v549_v30 = vpop.f32.mrb[5].mxu1 }
  0xf1   : > { %v602_v32 = vmax.f32 %v586_v18, 0.0  ;;  %v610_v33 = vmax.f32 %v594_v19, 0.0  ;;  %v510_v34 = vadd.f32 %v509_v28, %v1019_v39  ;;  %v550_v35 = vadd.f32 %v549_v30, %v353_v59 }
  0xf2   : > { %619 = vst [vmem:[%s1038_s26 + $0x18] sm:$0xff] %v603_v24  ;;  %627 = vst [vmem:[%s1038_s26 + $0x58] sm:$0xff] %v611_v25  ;;  %v589_v38 = vadd.f32 %v573_v21, %v515_v26  ;;  %v597_v42 = vadd.f32 %v581_v23, %v555_v27 }
  0xf3   : > { %618 = vst [vmem:[%s1038_s26 + $0x10] sm:$0xff] %v602_v32  ;;  %626 = vst [vmem:[%s1038_s26 + $0x50] sm:$0xff] %v610_v33  ;;  %v588_v43 = vadd.f32 %v572_v29, %v510_v34  ;;  %v596_v44 = vadd.f32 %v580_v31, %v550_v35  ;;  %v791_v45 = vpop.f32.mrb[6].mxu0  ;;  %v803_v47 = vpop.f32.mrb[6].mxu1 }
  0xf4   : > { %v605_v39 = vmax.f32 %v589_v38, 0.0  ;;  %v613_v49 = vmax.f32 %v597_v42, 0.0  ;;  %v525_v50 = vadd.f32 %v791_v45, %v1021_v40  ;;  %v565_v51 = vadd.f32 %v803_v47, %v368_v36  ;;  %v519_v52 = vpop.f32.mrb[7].mxu0  ;;  %v559_v54 = vpop.f32.mrb[7].mxu1 }
  0xf5   : > { %v604_v56 = vmax.f32 %v588_v43, 0.0  ;;  %v612_v57 = vmax.f32 %v596_v44, 0.0  ;;  %v520_v58 = vadd.f32 %v519_v52, %v1023_v41  ;;  %v560_v59 = vadd.f32 %v559_v54, %v363_v37 }
  0xf6   : > { %621 = vst [vmem:[%s1038_s26 + $0x28] sm:$0xff] %v605_v39  ;;  %629 = vst [vmem:[%s1038_s26 + $0x68] sm:$0xff] %v613_v49  ;;  %v591_v60 = vadd.f32 %v575_v46, %v525_v50  ;;  %v599_v61 = vadd.f32 %v583_v48, %v565_v51 }
  0xf7   : > { %620 = vst [vmem:[%s1038_s26 + $0x20] sm:$0xff] %v604_v56  ;;  %628 = vst [vmem:[%s1038_s26 + $0x60] sm:$0xff] %v612_v57  ;;  %v590_v40 = vadd.f32 %v574_v53, %v520_v58  ;;  %v598_v62 = vadd.f32 %v582_v55, %v560_v59 }
  0xf8   : > { %v607_v63 = vmax.f32 %v591_v60, 0.0  ;;  %v615_v0 = vmax.f32 %v599_v61, 0.0 }
  0xf9   : > { %v606_v1 = vmax.f32 %v590_v40, 0.0  ;;  %v614_v2 = vmax.f32 %v598_v62, 0.0 }
  0xfa   : > { %623 = vst [vmem:[%s1038_s26 + $0x38] sm:$0xff] %v607_v63  ;;  %631 = vst [vmem:[%s1038_s26 + $0x78] sm:$0xff] %v615_v0 }
  0xfb   : > { %622 = vst [vmem:[%s1038_s26 + $0x30] sm:$0xff] %v606_v1  ;;  %630 = vst [vmem:[%s1038_s26 + $0x70] sm:$0xff] %v614_v2 }
  0xfc PF: > { %s14_s17 = sadd.s32 1, %s855_s17   ;;  %s1085_s15 = smov %s851_s16 }
  0xfd   : > { %p11_p5 = scmp.ge.s32.totalorder %s14_s17, 4   ;;  %s1086_s16 = smov %s1088_s18 }
  0xff   :  { %13 = sbr.rel (!%p11_p5) target bundleno = 2 (0x2), region = 69 }

</bundles_post_ra>
